<compile_context>
chip_gen: v5e
topology: v5e:2x2
jax: 0.10.0
libtpu: 0.0.40
codegen_flags: <defaults>
</compile_context>

<pallas_src>
import functools
import math

import jax
import jax.numpy as jnp
from jax.experimental import pallas as pl
from jax.experimental.pallas import tpu as pltpu


# ----------------------------- fused kernel --------------------------------


def _fused_attn_kernel(x_ref, wkt_ref, bk_ref, wq_sel_ref, bq_sel_ref,
                       wk_sel_ref, bk_sel_ref, score_ref, k_ref,
                       *, inv_sqrt_c, n_split):
    """Fused q/k projection + score = softmax_dim1(q @ k.view(C, L) / sqrt(C)).

    Per batch element (statically unrolled over the batch block):
      k     = x @ Wk^T + bk                                     (module output)
      score = sum_g (x @ WqT_sel[g] + bq_sel[g]) @ (x @ WkT_sel[g] + bk_sel[g])
    where the g-th selected weight slabs reproduce q[:, a*m+g] and k[:, g*L+j]
    (m = C // L), i.e. exactly q @ k.view(C, L) with no in-kernel reshape and no
    unaligned lane slicing.  Dropout(0.2) in eval mode is the identity.
    """
    bb, L, _C = x_ref.shape
    for i in range(bb):                                    # static unroll
        x_i = x_ref[i]                                     # (L, C)

        # full k projection (returned to the caller)
        k_i = jnp.dot(x_i, wkt_ref[...],
                      preferred_element_type=jnp.float32) + bk_ref[...]
        k_ref[i] = k_i.astype(k_ref.dtype)

        # score = q @ k.view(C, L), decomposed into n_split full-tile matmuls
        s = jnp.zeros((L, L), jnp.float32)
        for g in range(n_split):
            a_g = jnp.dot(x_i, wq_sel_ref[g],
                          preferred_element_type=jnp.float32) + bq_sel_ref[g]
            b_g = jnp.dot(x_i, wk_sel_ref[g],
                          preferred_element_type=jnp.float32) + bk_sel_ref[g]
            s = s + jnp.dot(a_g, b_g, preferred_element_type=jnp.float32)
        s = s * inv_sqrt_c

        # nn.Softmax(dim=1) on the (B, L, L) score -> axis 0 of the (L, L) tile.
        mx = jnp.max(s, axis=0, keepdims=True)
        e = jnp.exp(s - mx)
        inv = pl.reciprocal(jnp.sum(e, axis=0, keepdims=True))
        score_ref[i] = (e * inv).astype(score_ref.dtype)


# --------------------- fallback kernels (C % L != 0) ------------------------


def _qk_kernel(x_ref, wqt_ref, bq_ref, wkt_ref, bk_ref, q_ref, k_ref):
    x = x_ref[0]                                           # (L, C)
    q_ref[0] = (jnp.dot(x, wqt_ref[...], preferred_element_type=jnp.float32)
                + bq_ref[...]).astype(q_ref.dtype)
    k_ref[0] = (jnp.dot(x, wkt_ref[...], preferred_element_type=jnp.float32)
                + bk_ref[...]).astype(k_ref.dtype)


def _score_kernel(q_ref, kt_ref, score_ref, *, inv_sqrt_c):
    s = jnp.dot(q_ref[0], kt_ref[0], preferred_element_type=jnp.float32) * inv_sqrt_c
    mx = jnp.max(s, axis=0, keepdims=True)
    e = jnp.exp(s - mx)
    score_ref[0] = (e * pl.reciprocal(jnp.sum(e, axis=0, keepdims=True))
                    ).astype(score_ref.dtype)


# ----------------------------- wrappers ------------------------------------


def scale_dot_product_attention(x, params, *, batch_block=1):
    """Pallas implementation of ScaleDotProductAttention.forward (eval mode).

    x: [B, K, W, D] float32.  Returns (score [B, L, L], k [B, L, C]),
    L = K, C = W * D.

    batch_block: batch elements per grid step.  Keep 1 (or B // 2) on v7x so its
    two TensorCores split the parallel batch axis; set to B on single-TC parts
    (v5e / v6e) to collapse the serial grid into a single step.
    """
    B, K, W, D = x.shape
    L, C = K, W * D
    x_flat = x.reshape(B, L, C).astype(jnp.float32)
    inv_sqrt_c = 1.0 / math.sqrt(C)

    # glue: pre-transpose PyTorch (out_features, in_features) weights
    wqt = params["wq"].T                 # (C, C): q = x @ wqt + bq
    wkt = params["wk"].T
    bq = params["bq"].reshape(1, C)
    bk = params["bk"].reshape(1, C)

    if C % L == 0 and B % batch_block == 0:
        # -------- fused single-call path (no HBM round-trip of q / k_t) --------
        m = C // L
        a_idx = jnp.arange(L)
        g_idx = jnp.arange(m)
        q_cols = a_idx[None, :] * m + g_idx[:, None]        # (m, L): a*m + g
        k_cols = g_idx[:, None] * L + a_idx[None, :]        # (m, L): g*L + j
        wq_sel = jnp.transpose(wqt[:, q_cols], (1, 0, 2))   # (m, C, L)
        wk_sel = jnp.transpose(wkt[:, k_cols], (1, 0, 2))   # (m, C, L)
        bq_sel = params["bq"][q_cols][:, None, :]           # (m, 1, L)
        bk_sel = params["bk"][k_cols][:, None, :]           # (m, 1, L)

        bb = batch_block
        kernel = functools.partial(_fused_attn_kernel,
                                   inv_sqrt_c=inv_sqrt_c, n_split=m)
        score, k = pl.pallas_call(
            kernel,
            out_shape=(jax.ShapeDtypeStruct((B, L, L), jnp.float32),
                       jax.ShapeDtypeStruct((B, L, C), jnp.float32)),
            grid_spec=pltpu.PrefetchScalarGridSpec(
                num_scalar_prefetch=0,
                grid=(B // bb,),
                in_specs=[
                    pl.BlockSpec((bb, L, C), lambda b: (b, 0, 0)),
                    pl.BlockSpec((C, C), lambda b: (0, 0)),
                    pl.BlockSpec((1, C), lambda b: (0, 0)),
                    pl.BlockSpec((m, C, L), lambda b: (0, 0, 0)),
                    pl.BlockSpec((m, 1, L), lambda b: (0, 0, 0)),
                    pl.BlockSpec((m, C, L), lambda b: (0, 0, 0)),
                    pl.BlockSpec((m, 1, L), lambda b: (0, 0, 0)),
                ],
                out_specs=[
                    pl.BlockSpec((bb, L, L), lambda b: (b, 0, 0)),
                    pl.BlockSpec((bb, L, C), lambda b: (b, 0, 0)),
                ],
            ),
            compiler_params=pltpu.CompilerParams(
                dimension_semantics=("parallel",)),
        )(x_flat, wkt, bk, wq_sel, bq_sel, wk_sel, bk_sel)
        return score, k

    # -------- general fallback (C % L != 0): two calls, k_t reshaped in JAX ----
    # TODO(synk): the fused decomposition needs C % L == 0; non-divisible shapes
    # fall back to the (still correct) two-call version with q/k through HBM.
    q, k = pl.pallas_call(
        _qk_kernel,
        out_shape=(jax.ShapeDtypeStruct((B, L, C), jnp.float32),
                   jax.ShapeDtypeStruct((B, L, C), jnp.float32)),
        grid_spec=pltpu.PrefetchScalarGridSpec(
            num_scalar_prefetch=0,
            grid=(B,),
            in_specs=[
                pl.BlockSpec((1, L, C), lambda b: (b, 0, 0)),
                pl.BlockSpec((C, C), lambda b: (0, 0)),
                pl.BlockSpec((1, C), lambda b: (0, 0)),
                pl.BlockSpec((C, C), lambda b: (0, 0)),
                pl.BlockSpec((1, C), lambda b: (0, 0)),
            ],
            out_specs=[
                pl.BlockSpec((1, L, C), lambda b: (b, 0, 0)),
                pl.BlockSpec((1, L, C), lambda b: (b, 0, 0)),
            ],
        ),
        compiler_params=pltpu.CompilerParams(dimension_semantics=("parallel",)),
    )(x_flat, wqt, bq, wkt, bk)

    k_t = k.reshape(B, C, L)   # PyTorch k.view(batch, c, length): raw reshape
    score = pl.pallas_call(
        functools.partial(_score_kernel, inv_sqrt_c=inv_sqrt_c),
        out_shape=jax.ShapeDtypeStruct((B, L, L), jnp.float32),
        grid_spec=pltpu.PrefetchScalarGridSpec(
            num_scalar_prefetch=0,
            grid=(B,),
            in_specs=[
                pl.BlockSpec((1, L, C), lambda b: (b, 0, 0)),
                pl.BlockSpec((1, C, L), lambda b: (b, 0, 0)),
            ],
            out_specs=pl.BlockSpec((1, L, L), lambda b: (b, 0, 0)),
        ),
        compiler_params=pltpu.CompilerParams(dimension_semantics=("parallel",)),
    )(q, k_t)
    return score, k


def test_forward(x, params):
    """Mirror of test.forward() to the extent it is defined in the source."""
    # TODO(synk): MAF's class definition is not provided in the reference source;
    # its log_prob (and the .mean() over it) cannot be reproduced faithfully, so
    # only the fully-defined ScaleDotProductAttention sub-module is implemented.
    return scale_dot_product_attention(x, params)


# ----------------------------- reference -----------------------------------


def attention_ref(x, params):
    B, K, W, D = x.shape
    L, C = K, W * D
    xf = x.reshape(B, L, C).astype(jnp.float32)
    q = xf @ params["wq"].T + params["bq"]
    k = xf @ params["wk"].T + params["bk"]
    kt = k.reshape(B, C, L)
    s = jnp.einsum("blc,bcm->blm", q, kt) / math.sqrt(C)
    s = jax.nn.softmax(s, axis=1)
    return s, k


def init_params(key, c):
    """Deterministic init matching nn.Linear's U(-1/sqrt(in), 1/sqrt(in))."""
    ks = jax.random.split(key, 6)
    bound = 1.0 / math.sqrt(c)
    u = lambda k, shape: jax.random.uniform(k, shape, jnp.float32, -bound, bound)
    return {
        "wq": u(ks[0], (c, c)), "bq": u(ks[1], (c,)),
        "wk": u(ks[2], (c, c)), "bk": u(ks[3], (c,)),
        # w_v exists in __init__ but is never used in forward; kept for parity.
        "wv": u(ks[4], (c, c)), "bv": u(ks[5], (c,)),
    }


if __name__ == "__main__":
    # Small shapes consistent with MTGFLOW's attention:
    #   batch=2, n_sensor(L)=8, window_size=16, input_size=2  ->  C = 32
    B, K, W, D = 2, 8, 16, 2
    C = W * D

    key = jax.random.PRNGKey(0)
    kx, kp = jax.random.split(key)
    x = jax.random.normal(kx, (B, K, W, D), dtype=jnp.float32)
    params = init_params(kp, C)

    score, k = jax.block_until_ready(test_forward(x, params))
    score_ref, k_ref = attention_ref(x, params)

    assert score.shape == (B, K, K) and k.shape == (B, K, C)
    assert jnp.allclose(score, score_ref, atol=1e-5, rtol=1e-5)
    assert jnp.allclose(k, k_ref, atol=1e-5, rtol=1e-5)

    print("KERNEL_OK")
</pallas_src>

<mosaic_0001>
module attributes {stable_mosaic.version = 11 : i64} {
  func.func @_fused_attn_kernel(%arg0: i32, %arg1: memref<1x8x32xf32, #tpu.memory_space<vmem>>, %arg2: memref<32x32xf32, #tpu.memory_space<vmem>>, %arg3: memref<1x32xf32, #tpu.memory_space<vmem>>, %arg4: memref<4x32x8xf32, #tpu.memory_space<vmem>>, %arg5: memref<4x1x8xf32, #tpu.memory_space<vmem>>, %arg6: memref<4x32x8xf32, #tpu.memory_space<vmem>>, %arg7: memref<4x1x8xf32, #tpu.memory_space<vmem>>, %arg8: memref<1x8x8xf32, #tpu.memory_space<vmem>>, %arg9: memref<1x8x32xf32, #tpu.memory_space<vmem>>) attributes {dimension_semantics = [#tpu.dimension_semantics<parallel>], iteration_bounds = array<i64: 2>, scalar_prefetch = 0 : i64, scratch_operands = 0 : i64, tpu.core_type = #tpu.core_type<tc>, window_params = [{transform_indices = @transform_0, window_bounds = array<i64: 1, 8, 32>}, {pipeline_mode = #tpu.pipeline_mode<synchronous>, transform_indices = @transform_1, window_bounds = array<i64: 32, 32>}, {pipeline_mode = #tpu.pipeline_mode<synchronous>, transform_indices = @transform_2, window_bounds = array<i64: 1, 32>}, {pipeline_mode = #tpu.pipeline_mode<synchronous>, transform_indices = @transform_3, window_bounds = array<i64: 4, 32, 8>}, {pipeline_mode = #tpu.pipeline_mode<synchronous>, transform_indices = @transform_4, window_bounds = array<i64: 4, 1, 8>}, {pipeline_mode = #tpu.pipeline_mode<synchronous>, transform_indices = @transform_5, window_bounds = array<i64: 4, 32, 8>}, {pipeline_mode = #tpu.pipeline_mode<synchronous>, transform_indices = @transform_6, window_bounds = array<i64: 4, 1, 8>}, {transform_indices = @transform_7, window_bounds = array<i64: 1, 8, 8>}, {transform_indices = @transform_8, window_bounds = array<i64: 1, 8, 32>}]} {
    %c0 = arith.constant 0 : index
    %c0_0 = arith.constant 0 : index
    %c0_1 = arith.constant 0 : index
    %0 = vector.load %arg1[%c0, %c0_0, %c0_1] : memref<1x8x32xf32, #tpu.memory_space<vmem>>, vector<1x8x32xf32>
    %1 = vector.shape_cast %0 : vector<1x8x32xf32> to vector<8x32xf32>
    %c0_2 = arith.constant 0 : index
    %c0_3 = arith.constant 0 : index
    %2 = vector.load %arg2[%c0_2, %c0_3] : memref<32x32xf32, #tpu.memory_space<vmem>>, vector<32x32xf32>
    %cst = arith.constant dense<0.000000e+00> : vector<8x32xf32>
    %3 = tpu.matmul %1, %2, %cst {dimension_numbers = #tpu.dot_dimension_numbers<[1], [0], [0], [1], [0, 0, 1, 1], [], []>} : vector<8x32xf32>, vector<32x32xf32>, vector<8x32xf32> -> vector<8x32xf32>
    %c0_4 = arith.constant 0 : index
    %c0_5 = arith.constant 0 : index
    %4 = vector.load %arg3[%c0_4, %c0_5] : memref<1x32xf32, #tpu.memory_space<vmem>>, vector<1x32xf32>
    %5 = vector.broadcast %4 : vector<1x32xf32> to vector<8x32xf32>
    %6 = arith.addf %3, %5 : vector<8x32xf32>
    %c0_6 = arith.constant 0 : index
    %c0_7 = arith.constant 0 : index
    %c0_8 = arith.constant 0 : index
    %7 = vector.load %arg9[%c0_6, %c0_7, %c0_8] : memref<1x8x32xf32, #tpu.memory_space<vmem>>, vector<1x8x32xf32>
    %8 = vector.shape_cast %7 : vector<1x8x32xf32> to vector<8x32xf32>
    %9 = vector.shape_cast %6 : vector<8x32xf32> to vector<1x8x32xf32>
    tpu.vector_store %arg9[%c0_6, %c0_7, %c0_8], %9 {strides = array<i32>} : memref<1x8x32xf32, #tpu.memory_space<vmem>>, vector<1x8x32xf32>,
    %cst_9 = arith.constant 0.000000e+00 : f32
    %10 = vector.broadcast %cst_9 : f32 to vector<8x8xf32>
    %c0_10 = arith.constant 0 : index
    %c0_11 = arith.constant 0 : index
    %c0_12 = arith.constant 0 : index
    %11 = vector.load %arg4[%c0_10, %c0_11, %c0_12] : memref<4x32x8xf32, #tpu.memory_space<vmem>>, vector<1x32x8xf32>
    %12 = vector.shape_cast %11 : vector<1x32x8xf32> to vector<32x8xf32>
    %cst_13 = arith.constant dense<0.000000e+00> : vector<8x8xf32>
    %13 = tpu.matmul %1, %12, %cst_13 {dimension_numbers = #tpu.dot_dimension_numbers<[1], [0], [0], [1], [0, 0, 1, 1], [], []>} : vector<8x32xf32>, vector<32x8xf32>, vector<8x8xf32> -> vector<8x8xf32>
    %c0_14 = arith.constant 0 : index
    %c0_15 = arith.constant 0 : index
    %c0_16 = arith.constant 0 : index
    %14 = vector.load %arg5[%c0_14, %c0_15, %c0_16] : memref<4x1x8xf32, #tpu.memory_space<vmem>>, vector<1x1x8xf32>
    %15 = vector.shape_cast %14 : vector<1x1x8xf32> to vector<1x8xf32>
    %16 = vector.broadcast %15 : vector<1x8xf32> to vector<8x8xf32>
    %17 = arith.addf %13, %16 : vector<8x8xf32>
    %c0_17 = arith.constant 0 : index
    %c0_18 = arith.constant 0 : index
    %c0_19 = arith.constant 0 : index
    %18 = vector.load %arg6[%c0_17, %c0_18, %c0_19] : memref<4x32x8xf32, #tpu.memory_space<vmem>>, vector<1x32x8xf32>
    %19 = vector.shape_cast %18 : vector<1x32x8xf32> to vector<32x8xf32>
    %cst_20 = arith.constant dense<0.000000e+00> : vector<8x8xf32>
    %20 = tpu.matmul %1, %19, %cst_20 {dimension_numbers = #tpu.dot_dimension_numbers<[1], [0], [0], [1], [0, 0, 1, 1], [], []>} : vector<8x32xf32>, vector<32x8xf32>, vector<8x8xf32> -> vector<8x8xf32>
    %c0_21 = arith.constant 0 : index
    %c0_22 = arith.constant 0 : index
    %c0_23 = arith.constant 0 : index
    %21 = vector.load %arg7[%c0_21, %c0_22, %c0_23] : memref<4x1x8xf32, #tpu.memory_space<vmem>>, vector<1x1x8xf32>
    %22 = vector.shape_cast %21 : vector<1x1x8xf32> to vector<1x8xf32>
    %23 = vector.broadcast %22 : vector<1x8xf32> to vector<8x8xf32>
    %24 = arith.addf %20, %23 : vector<8x8xf32>
    %cst_24 = arith.constant dense<0.000000e+00> : vector<8x8xf32>
    %25 = tpu.matmul %17, %24, %cst_24 {dimension_numbers = #tpu.dot_dimension_numbers<[1], [0], [0], [1], [0, 0, 1, 1], [], []>} : vector<8x8xf32>, vector<8x8xf32>, vector<8x8xf32> -> vector<8x8xf32>
    %26 = arith.addf %10, %25 : vector<8x8xf32>
    %c1 = arith.constant 1 : index
    %c0_25 = arith.constant 0 : index
    %c0_26 = arith.constant 0 : index
    %27 = vector.load %arg4[%c1, %c0_25, %c0_26] : memref<4x32x8xf32, #tpu.memory_space<vmem>>, vector<1x32x8xf32>
    %28 = vector.shape_cast %27 : vector<1x32x8xf32> to vector<32x8xf32>
    %cst_27 = arith.constant dense<0.000000e+00> : vector<8x8xf32>
    %29 = tpu.matmul %1, %28, %cst_27 {dimension_numbers = #tpu.dot_dimension_numbers<[1], [0], [0], [1], [0, 0, 1, 1], [], []>} : vector<8x32xf32>, vector<32x8xf32>, vector<8x8xf32> -> vector<8x8xf32>
    %c1_28 = arith.constant 1 : index
    %c0_29 = arith.constant 0 : index
    %c0_30 = arith.constant 0 : index
    %30 = vector.load %arg5[%c1_28, %c0_29, %c0_30] : memref<4x1x8xf32, #tpu.memory_space<vmem>>, vector<1x1x8xf32>
    %31 = vector.shape_cast %30 : vector<1x1x8xf32> to vector<1x8xf32>
    %32 = vector.broadcast %31 : vector<1x8xf32> to vector<8x8xf32>
    %33 = arith.addf %29, %32 : vector<8x8xf32>
    %c1_31 = arith.constant 1 : index
    %c0_32 = arith.constant 0 : index
    %c0_33 = arith.constant 0 : index
    %34 = vector.load %arg6[%c1_31, %c0_32, %c0_33] : memref<4x32x8xf32, #tpu.memory_space<vmem>>, vector<1x32x8xf32>
    %35 = vector.shape_cast %34 : vector<1x32x8xf32> to vector<32x8xf32>
    %cst_34 = arith.constant dense<0.000000e+00> : vector<8x8xf32>
    %36 = tpu.matmul %1, %35, %cst_34 {dimension_numbers = #tpu.dot_dimension_numbers<[1], [0], [0], [1], [0, 0, 1, 1], [], []>} : vector<8x32xf32>, vector<32x8xf32>, vector<8x8xf32> -> vector<8x8xf32>
    %c1_35 = arith.constant 1 : index
    %c0_36 = arith.constant 0 : index
    %c0_37 = arith.constant 0 : index
    %37 = vector.load %arg7[%c1_35, %c0_36, %c0_37] : memref<4x1x8xf32, #tpu.memory_space<vmem>>, vector<1x1x8xf32>
    %38 = vector.shape_cast %37 : vector<1x1x8xf32> to vector<1x8xf32>
    %39 = vector.broadcast %38 : vector<1x8xf32> to vector<8x8xf32>
    %40 = arith.addf %36, %39 : vector<8x8xf32>
    %cst_38 = arith.constant dense<0.000000e+00> : vector<8x8xf32>
    %41 = tpu.matmul %33, %40, %cst_38 {dimension_numbers = #tpu.dot_dimension_numbers<[1], [0], [0], [1], [0, 0, 1, 1], [], []>} : vector<8x8xf32>, vector<8x8xf32>, vector<8x8xf32> -> vector<8x8xf32>
    %42 = arith.addf %26, %41 : vector<8x8xf32>
    %c2 = arith.constant 2 : index
    %c0_39 = arith.constant 0 : index
    %c0_40 = arith.constant 0 : index
    %43 = vector.load %arg4[%c2, %c0_39, %c0_40] : memref<4x32x8xf32, #tpu.memory_space<vmem>>, vector<1x32x8xf32>
    %44 = vector.shape_cast %43 : vector<1x32x8xf32> to vector<32x8xf32>
    %cst_41 = arith.constant dense<0.000000e+00> : vector<8x8xf32>
    %45 = tpu.matmul %1, %44, %cst_41 {dimension_numbers = #tpu.dot_dimension_numbers<[1], [0], [0], [1], [0, 0, 1, 1], [], []>} : vector<8x32xf32>, vector<32x8xf32>, vector<8x8xf32> -> vector<8x8xf32>
    %c2_42 = arith.constant 2 : index
    %c0_43 = arith.constant 0 : index
    %c0_44 = arith.constant 0 : index
    %46 = vector.load %arg5[%c2_42, %c0_43, %c0_44] : memref<4x1x8xf32, #tpu.memory_space<vmem>>, vector<1x1x8xf32>
    %47 = vector.shape_cast %46 : vector<1x1x8xf32> to vector<1x8xf32>
    %48 = vector.broadcast %47 : vector<1x8xf32> to vector<8x8xf32>
    %49 = arith.addf %45, %48 : vector<8x8xf32>
    %c2_45 = arith.constant 2 : index
    %c0_46 = arith.constant 0 : index
    %c0_47 = arith.constant 0 : index
    %50 = vector.load %arg6[%c2_45, %c0_46, %c0_47] : memref<4x32x8xf32, #tpu.memory_space<vmem>>, vector<1x32x8xf32>
    %51 = vector.shape_cast %50 : vector<1x32x8xf32> to vector<32x8xf32>
    %cst_48 = arith.constant dense<0.000000e+00> : vector<8x8xf32>
    %52 = tpu.matmul %1, %51, %cst_48 {dimension_numbers = #tpu.dot_dimension_numbers<[1], [0], [0], [1], [0, 0, 1, 1], [], []>} : vector<8x32xf32>, vector<32x8xf32>, vector<8x8xf32> -> vector<8x8xf32>
    %c2_49 = arith.constant 2 : index
    %c0_50 = arith.constant 0 : index
    %c0_51 = arith.constant 0 : index
    %53 = vector.load %arg7[%c2_49, %c0_50, %c0_51] : memref<4x1x8xf32, #tpu.memory_space<vmem>>, vector<1x1x8xf32>
    %54 = vector.shape_cast %53 : vector<1x1x8xf32> to vector<1x8xf32>
    %55 = vector.broadcast %54 : vector<1x8xf32> to vector<8x8xf32>
    %56 = arith.addf %52, %55 : vector<8x8xf32>
    %cst_52 = arith.constant dense<0.000000e+00> : vector<8x8xf32>
    %57 = tpu.matmul %49, %56, %cst_52 {dimension_numbers = #tpu.dot_dimension_numbers<[1], [0], [0], [1], [0, 0, 1, 1], [], []>} : vector<8x8xf32>, vector<8x8xf32>, vector<8x8xf32> -> vector<8x8xf32>
    %58 = arith.addf %42, %57 : vector<8x8xf32>
    %c3 = arith.constant 3 : index
    %c0_53 = arith.constant 0 : index
    %c0_54 = arith.constant 0 : index
    %59 = vector.load %arg4[%c3, %c0_53, %c0_54] : memref<4x32x8xf32, #tpu.memory_space<vmem>>, vector<1x32x8xf32>
    %60 = vector.shape_cast %59 : vector<1x32x8xf32> to vector<32x8xf32>
    %cst_55 = arith.constant dense<0.000000e+00> : vector<8x8xf32>
    %61 = tpu.matmul %1, %60, %cst_55 {dimension_numbers = #tpu.dot_dimension_numbers<[1], [0], [0], [1], [0, 0, 1, 1], [], []>} : vector<8x32xf32>, vector<32x8xf32>, vector<8x8xf32> -> vector<8x8xf32>
    %c3_56 = arith.constant 3 : index
    %c0_57 = arith.constant 0 : index
    %c0_58 = arith.constant 0 : index
    %62 = vector.load %arg5[%c3_56, %c0_57, %c0_58] : memref<4x1x8xf32, #tpu.memory_space<vmem>>, vector<1x1x8xf32>
    %63 = vector.shape_cast %62 : vector<1x1x8xf32> to vector<1x8xf32>
    %64 = vector.broadcast %63 : vector<1x8xf32> to vector<8x8xf32>
    %65 = arith.addf %61, %64 : vector<8x8xf32>
    %c3_59 = arith.constant 3 : index
    %c0_60 = arith.constant 0 : index
    %c0_61 = arith.constant 0 : index
    %66 = vector.load %arg6[%c3_59, %c0_60, %c0_61] : memref<4x32x8xf32, #tpu.memory_space<vmem>>, vector<1x32x8xf32>
    %67 = vector.shape_cast %66 : vector<1x32x8xf32> to vector<32x8xf32>
    %cst_62 = arith.constant dense<0.000000e+00> : vector<8x8xf32>
    %68 = tpu.matmul %1, %67, %cst_62 {dimension_numbers = #tpu.dot_dimension_numbers<[1], [0], [0], [1], [0, 0, 1, 1], [], []>} : vector<8x32xf32>, vector<32x8xf32>, vector<8x8xf32> -> vector<8x8xf32>
    %c3_63 = arith.constant 3 : index
    %c0_64 = arith.constant 0 : index
    %c0_65 = arith.constant 0 : index
    %69 = vector.load %arg7[%c3_63, %c0_64, %c0_65] : memref<4x1x8xf32, #tpu.memory_space<vmem>>, vector<1x1x8xf32>
    %70 = vector.shape_cast %69 : vector<1x1x8xf32> to vector<1x8xf32>
    %71 = vector.broadcast %70 : vector<1x8xf32> to vector<8x8xf32>
    %72 = arith.addf %68, %71 : vector<8x8xf32>
    %cst_66 = arith.constant dense<0.000000e+00> : vector<8x8xf32>
    %73 = tpu.matmul %65, %72, %cst_66 {dimension_numbers = #tpu.dot_dimension_numbers<[1], [0], [0], [1], [0, 0, 1, 1], [], []>} : vector<8x8xf32>, vector<8x8xf32>, vector<8x8xf32> -> vector<8x8xf32>
    %74 = arith.addf %58, %73 : vector<8x8xf32>
    %cst_67 = arith.constant 0.176776692 : f32
    %75 = vector.broadcast %cst_67 : f32 to vector<8x8xf32>
    %76 = arith.mulf %74, %75 : vector<8x8xf32>
    %cst_68 = arith.constant dense<0xFF800000> : vector<8xf32>
    %77 = vector.multi_reduction <maximumf>, %76, %cst_68 [0] : vector<8x8xf32> to vector<8xf32>
    %78 = vector.shape_cast %77 : vector<8xf32> to vector<1x8xf32>
    %79 = vector.broadcast %78 : vector<1x8xf32> to vector<8x8xf32>
    %80 = arith.subf %76, %79 : vector<8x8xf32>
    %81 = math.exp %80 : vector<8x8xf32>
    %cst_69 = arith.constant dense<0.000000e+00> : vector<8xf32>
    %82 = vector.multi_reduction <add>, %81, %cst_69 [0] : vector<8x8xf32> to vector<8xf32>
    %83 = vector.shape_cast %82 : vector<8xf32> to vector<1x8xf32>
    %84 = tpu.reciprocal %83 : vector<1x8xf32> -> vector<1x8xf32>
    %85 = vector.broadcast %84 : vector<1x8xf32> to vector<8x8xf32>
    %86 = arith.mulf %81, %85 : vector<8x8xf32>
    %c0_70 = arith.constant 0 : index
    %c0_71 = arith.constant 0 : index
    %c0_72 = arith.constant 0 : index
    %87 = vector.load %arg8[%c0_70, %c0_71, %c0_72] : memref<1x8x8xf32, #tpu.memory_space<vmem>>, vector<1x8x8xf32>
    %88 = vector.shape_cast %87 : vector<1x8x8xf32> to vector<8x8xf32>
    %89 = vector.shape_cast %86 : vector<8x8xf32> to vector<1x8x8xf32>
    tpu.vector_store %arg8[%c0_70, %c0_71, %c0_72], %89 {strides = array<i32>} : memref<1x8x8xf32, #tpu.memory_space<vmem>>, vector<1x8x8xf32>,
    return
  }
  func.func @transform_0(%arg0: i32) -> (i32, i32, i32) {
    %c0_i32 = arith.constant 0 : i32
    %c0_i32_0 = arith.constant 0 : i32
    %c0_i32_1 = arith.constant 0 : i32
    return %arg0, %c0_i32, %c0_i32_0 : i32, i32, i32
  }
  func.func @transform_1(%arg0: i32) -> (i32, i32) {
    %c0_i32 = arith.constant 0 : i32
    %c0_i32_0 = arith.constant 0 : i32
    %c0_i32_1 = arith.constant 0 : i32
    return %c0_i32, %c0_i32_0 : i32, i32
  }
  func.func @transform_2(%arg0: i32) -> (i32, i32) {
    %c0_i32 = arith.constant 0 : i32
    %c0_i32_0 = arith.constant 0 : i32
    %c0_i32_1 = arith.constant 0 : i32
    return %c0_i32, %c0_i32_0 : i32, i32
  }
  func.func @transform_3(%arg0: i32) -> (i32, i32, i32) {
    %c0_i32 = arith.constant 0 : i32
    %c0_i32_0 = arith.constant 0 : i32
    %c0_i32_1 = arith.constant 0 : i32
    %c0_i32_2 = arith.constant 0 : i32
    return %c0_i32, %c0_i32_0, %c0_i32_1 : i32, i32, i32
  }
  func.func @transform_4(%arg0: i32) -> (i32, i32, i32) {
    %c0_i32 = arith.constant 0 : i32
    %c0_i32_0 = arith.constant 0 : i32
    %c0_i32_1 = arith.constant 0 : i32
    %c0_i32_2 = arith.constant 0 : i32
    return %c0_i32, %c0_i32_0, %c0_i32_1 : i32, i32, i32
  }
  func.func @transform_5(%arg0: i32) -> (i32, i32, i32) {
    %c0_i32 = arith.constant 0 : i32
    %c0_i32_0 = arith.constant 0 : i32
    %c0_i32_1 = arith.constant 0 : i32
    %c0_i32_2 = arith.constant 0 : i32
    return %c0_i32, %c0_i32_0, %c0_i32_1 : i32, i32, i32
  }
  func.func @transform_6(%arg0: i32) -> (i32, i32, i32) {
    %c0_i32 = arith.constant 0 : i32
    %c0_i32_0 = arith.constant 0 : i32
    %c0_i32_1 = arith.constant 0 : i32
    %c0_i32_2 = arith.constant 0 : i32
    return %c0_i32, %c0_i32_0, %c0_i32_1 : i32, i32, i32
  }
  func.func @transform_7(%arg0: i32) -> (i32, i32, i32) {
    %c0_i32 = arith.constant 0 : i32
    %c0_i32_0 = arith.constant 0 : i32
    %c0_i32_1 = arith.constant 0 : i32
    return %arg0, %c0_i32, %c0_i32_0 : i32, i32, i32
  }
  func.func @transform_8(%arg0: i32) -> (i32, i32, i32) {
    %c0_i32 = arith.constant 0 : i32
    %c0_i32_0 = arith.constant 0 : i32
    %c0_i32_1 = arith.constant 0 : i32
    return %arg0, %c0_i32, %c0_i32_0 : i32, i32, i32
  }
}

</mosaic_0001>

<bundles_post_ra>
// kernel: tpu_custom_call.1
= control target key start
LH: loop header
LB: loop body
LE: loop exit
PB: predicated region body
PF: predicated region fallthrough
CT: control target
= control target key end

     0   :  { %s1370_s0 = inlined_call_operand.vmem [shape: f32[2,8,32], index: 0, kind: input, shape index: {}]   ;;  %s1371_s1 = inlined_call_operand.vmem [shape: f32[32,32], index: 1, kind: input, shape index: {}]   ;;  %s1372_s2 = inlined_call_operand.vmem [shape: f32[1,32], index: 2, kind: input, shape index: {}]   ;;  %s1373_s3 = inlined_call_operand.vmem [shape: f32[4,32,8], index: 3, kind: input, shape index: {}]   ;;  %s1374_s4 = inlined_call_operand.vmem [shape: f32[4,1,8], index: 4, kind: input, shape index: {}]   ;;  %s1375_s5 = inlined_call_operand.vmem [shape: f32[4,32,8], index: 5, kind: input, shape index: {}]   ;;  %s1376_s6 = inlined_call_operand.vmem [shape: f32[4,1,8], index: 6, kind: input, shape index: {}]   ;;  %s1377_s7 = inlined_call_operand.hbm [shape: f32[2,8,8], index: 7, kind: output, shape index: {0}]   ;;  %s1378_s8 = inlined_call_operand.hbm [shape: f32[2,8,32], index: 8, kind: output, shape index: {1}]  }
   0x1   :  { %1380 = sst [smem:[#allocation8_spill]] %s1370_s0 }
   0x2   :  { %1381 = sst [smem:[#allocation9_spill]] %s1371_s1 }
   0x3   :  { %1382 = sst [smem:[#allocation10_spill]] %s1372_s2 }
   0x4   :  { %14 = vsyncpa [#allocation3], 0 }
   0x5   :  { %16 = vsyncpa [#allocation3 + $0x1], 0 }
   0x6   :  { %17 = vsyncpa [#allocation5], 0 }
   0x7   :  { %19 = vsyncpa [#allocation5 + $0x1], 0  ;;  %s1092_s27 = smov 0   ;;  %s1094_s28 = smov 0  }
   0x8   :  { %s1096_s29 = smov 0   ;;  %s1098_s30 = smov 0  }
   0x9 LB: > { %s1113_s9 = sadd.s32 4294967295, %s1045_s30   ;;  %s838_s10 = sadd.s32 4294967294, %s1045_s30   ;;  %s1045_s30 = sphi %s1098_s30, %s1392_s30   ;;  %s1041_s29 = sphi %s1096_s29, %s1391_s29   ;;  %s1037_s28 = sphi %s1094_s28, %s1390_s28   ;;  %s1033_s27 = sphi %s1092_s27, %s1389_s27  }
   0xa   : > { %s1117_s11 = sadd.s32 1, %s1045_s30   ;;  %s184_s12 = sadd.s32 1, %s1041_s29 }
   0xb   : > { %s181_s13 = ssub.s32 %s1045_s30, %s1117_s11  ;;  %p194_p0 = scmp.ne.s32.totalorder %s1041_s29, %s1037_s28 }
   0xc   : > { %p182_p1 = scmp.eq.s32.totalorder %s181_s13, 0  ;;  %p195_p2 = scmp.eq.s32.totalorder %s1113_s9, 1 }
   0xd   : > { %p200_p3 = scmp.ne.s32.totalorder %s1037_s28, %s1033_s27  ;;  %p201_p4 = scmp.eq.s32.totalorder %s838_s10, 1 }
   0xe   : > { %s1128_s14 = scalar_select %p182_p1, %s1041_s29, %s184_s12  }
   0xf   : > { %p1130_p5 = por %p195_p2, %p194_p0  ;;  %p1134_p6 = por %p201_p4, %p200_p3 }
  0x10   : > { %p841_p7 = scmp.ge.s32.totalorder %s1045_s30, 1  ;;  %p270_p8 = scmp.lt.s32.totalorder %s1045_s30, 3 }
  0x12   : > { %p271_p9 = pnand %p841_p7, %p270_p8 }
  0x13   : > { %p308_p10 = scmp.lt.s32.totalorder (!%p271_p9), %s1113_s9, 1  ;;  %s1385_s1 = sld [smem:[#allocation9_spill]] (!%p271_p9) }
  0x14   : > { %274 = sbr.rel (%p271_p9) target bundleno = 499 (0x1f3), region = 48  ;;  %s1386_s0 = sld [smem:[#allocation8_spill]] (!%p271_p9) }
  0x15   : > { %s1387_s2 = sld [smem:[#allocation10_spill]] (!%p271_p9)  ;;  %s890_s17 = sshll.u32 (!%p271_p9), %s1113_s9, 3 }
  0x16   : > { %s741_s21 = scalar_lea.hbm (!%p271_p9), %s1378_s8, %s890_s17 }
  0x19   : > { %v377_v0 = vld [vmem:[%s1375_s5 + $0x18] sm:$0xff]  ;;  %v376_v1 = vld [vmem:[%s1375_s5 + $0x10] sm:$0xff]  ;;  %v375_v4 = vld [vmem:[%s1375_s5 + $0x8] sm:$0xff]  ;;  %s309_s13 = scalar_select %p308_p10, %s1113_s9, 1  ;;  %vm321_vm0 = vcmask 261120   ;;  %vm462_vm1 = vcmask 64512  }
  0x1a   : > { %394 = vmatpush.msra.mxu2 %v377_v0  ;;  %v316_v2 = vld [vmem:[%s1385_s1 + $0x18] sm:$0xff]  ;;  %v315_v3 = vld [vmem:[%s1385_s1 + $0x10] sm:$0xff]  ;;  %v314_v7 = vld [vmem:[%s1385_s1 + $0x8] sm:$0xff] }
  0x1b   : > { %337 = vmatpush.msra.mxu0 %v316_v2  ;;  %v349_v5 = vld [vmem:[%s1373_s3 + $0x18] sm:$0xff]  ;;  %v348_v8 = vld [vmem:[%s1373_s3 + $0x10] sm:$0xff]  ;;  %v374_v10 = vld [vmem:[%s1375_s5] sm:$0xff]  ;;  %s844_s10 = sshll.u32 %s309_s13, 3  ;;  %s745_s13 = sshll.u32 %s741_s21, 4  ;;  %s746_s13 = int_to_ptr.hbm [resolvable:$true] %s745_s13 }
  0x1c   : > { %v851_v6 = vld [vmem:[%s1373_s3 + $0x38] sm:$0xff]  ;;  %395 = vmatpush.msra.mxu2 %v376_v1  ;;  %366 = vmatpush.msra.mxu1 %v349_v5  ;;  %v850_v9 = vld [vmem:[%s1373_s3 + $0x30] sm:$0xff]  ;;  %v347_v11 = vld [vmem:[%s1373_s3 + $0x8] sm:$0xff]  ;;  %s311_s20 = scalar_lea.vmem %s1386_s0, %s844_s10  ;;  %s1269_s10 = sand.u32 1, %s1037_s28  }
  0x1d   : > { %338 = vmatpush.msra.mxu0 %v315_v3  ;;  %424 = vmatpush.msra.mxu3 %v851_v6  ;;  %v313_v12 = vld [vmem:[%s1385_s1] sm:$0xff]  ;;  %v849_v14 = vld [vmem:[%s1373_s3 + $0x28] sm:$0xff]  ;;  %v857_v16 = vld [vmem:[%s1375_s5 + $0x38] sm:$0xff]  ;;  %s1379_s12 = sshll.u32 %s1269_s10, 3  ;;  %s717_s23 = scalar_lea.sflag [#allocation5], %s1269_s10 }
  0x1e   : > { %396 = vmatpush.msra.mxu2 %v375_v4  ;;  %367 = vmatpush.msra.mxu1 %v348_v8  ;;  %v1184_v13 = vld [vmem:[%s311_s20] sm:$0xff]  ;;  %v856_v18 = vld [vmem:[%s1375_s5 + $0x30] sm:$0xff]  ;;  %v865_v19 = vld [vmem:[%s1373_s3 + $0x58] sm:$0xff]  ;;  %s1277_s19 = scalar_lea.vmem [#allocation4], %s1379_s12  ;;  %s965_s24 = sshra.s32 %s746_s13, 4  ;;  %s966_s24 = int_to_ptr.hbm [resolvable:$true] %s965_s24 }
  0x1f   : > { %339 = vmatpush.msra.mxu0 %v314_v7  ;;  %425 = vmatpush.msra.mxu3 %v850_v9  ;;  %v346_v15 = vld [vmem:[%s1373_s3] sm:$0xff]  ;;  %v855_v20 = vld [vmem:[%s1375_s5 + $0x28] sm:$0xff]  ;;  %v864_v21 = vld [vmem:[%s1373_s3 + $0x50] sm:$0xff]  ;;  %s743_s22 = sshll.u32 %s1277_s19, 4  ;;  %s967_s25 = scalar_lea.hbm %s966_s24, 8  ;;  %s744_s22 = int_to_ptr.vmem [resolvable:$true] %s743_s22 }
  0x20   : > { %397 = vmatpush.msra.mxu2 %v374_v10  ;;  %368 = vmatpush.msra.mxu1 %v347_v11  ;;  %v848_v17 = vld [vmem:[%s1373_s3 + $0x20] sm:$0xff]  ;;  %v863_v23 = vld [vmem:[%s1373_s3 + $0x48] sm:$0xff]  ;;  %v871_v24 = vld [vmem:[%s1375_s5 + $0x58] sm:$0xff]  ;;  %p968_p11 = scmp.ne.s32.totalorder %s966_s24, %s967_s25  ;;  %s971_s0 = scalar_lea.hbm %s1378_s8, 16 }
  0x21   : > { %847 = vmatmul.msk.f32.vlgmr.msra.gmra.mxu2 %vm321_vm0, %v1184_v13  ;;  %340 = vmatpush.msra.mxu0 %v313_v12  ;;  %v854_v22 = vld [vmem:[%s1375_s5 + $0x20] sm:$0xff]  ;;  %v870_v26 = vld [vmem:[%s1375_s5 + $0x50] sm:$0xff]  ;;  %v869_v27 = vld [vmem:[%s1375_s5 + $0x48] sm:$0xff]  ;;  %p972_p0 = scmp.lt.s32.totalorder %s966_s24, %s1378_s8  ;;  %p973_p1 = scmp.lt.s32.totalorder %s971_s0, %s967_s25 }
  0x22   : > { %845 = vmatmul.msk.f32.vlgmr.msra.gmra.mxu0 %vm321_vm0, %v1184_v13  ;;  %426 = vmatpush.msra.mxu3 %v849_v14  ;;  %v862_v25 = vld [vmem:[%s1373_s3 + $0x40] sm:$0xff]  ;;  %v884_v29 = vld [vmem:[%s1375_s5 + $0x78] sm:$0xff]  ;;  %v883_v30 = vld [vmem:[%s1375_s5 + $0x70] sm:$0xff]  ;;  %p969_p12 = pnand %p968_p11, %p1130_p5 }
  0x23   : > { %369 = vmatpush.msra.mxu1 %v346_v15  ;;  %454 = vmatpush.msrb.mxu0 %v857_v16  ;;  %v868_v28 = vld [vmem:[%s1375_s5 + $0x40] sm:$0xff]  ;;  %v882_v31 = vld [vmem:[%s1375_s5 + $0x68] sm:$0xff]  ;;  %v878_v44 = vld [vmem:[%s1373_s3 + $0x78] sm:$0xff]  ;;  %p974_p2 = por %p973_p1, %p972_p0 }
  0x24   : > { %846 = vmatmul.msk.f32.vlgmr.msra.gmra.mxu1 %vm321_vm0, %v1184_v13  ;;  %427 = vmatpush.msra.mxu3 %v848_v17  ;;  %v881_v32 = vld [vmem:[%s1375_s5 + $0x60] sm:$0xff]  ;;  %v877_v47 = vld [vmem:[%s1373_s3 + $0x70] sm:$0xff]  ;;  %v876_v50 = vld [vmem:[%s1373_s3 + $0x68] sm:$0xff]  ;;  %p970_p13 = pneg %p969_p12 }
  0x25   : > { %853 = vmatmul.msk.f32.vlgmr.msra.gmra.mxu3 %vm321_vm0, %v1184_v13  ;;  %455 = vmatpush.msrb.mxu0 %v856_v18  ;;  %v938_v33 = vld [vmem:[%s1387_s2] ss:$0 sm:$0xff]  ;;  %v941_v41 = vld [vmem:[%s1376_s6 + $0x1] ss:$0 sm:$0xff]  ;;  %v943_v52 = vld [vmem:[%s1376_s6 + $0x2] ss:$0 sm:$0xff] }
  0x26   : > { %531 = vmatpush.msrb.mxu3 %v865_v19  ;;  %v940_v36 = vld [vmem:[%s1374_s4] ss:$0 sm:$0xff]  ;;  %v942_v43 = vld [vmem:[%s1374_s4 + $0x1] ss:$0 sm:$0xff]  ;;  %v944_v53 = vld [vmem:[%s1374_s4 + $0x2] ss:$0 sm:$0xff]  ;;  %p975_p3 = pnand %p974_p2, %p970_p13 }
  0x27   : > { %456 = vmatpush.msrb.mxu0 %v855_v20  ;;  %v939_v37 = vld [vmem:[%s1376_s6] ss:$0 sm:$0xff]  ;;  %v945_v58 = vld [vmem:[%s1376_s6 + $0x3] ss:$0 sm:$0xff] }
  0x28   : > { %532 = vmatpush.msrb.mxu3 %v864_v21  ;;  %v875_v51 = vld [vmem:[%s1373_s3 + $0x60] sm:$0xff] }
  0x29   : > { %457 = vmatpush.msrb.mxu0 %v854_v22  ;;  %v946_v62 = vld [vmem:[%s1374_s4 + $0x3] ss:$0 sm:$0xff] }
  0x2a   : > { %859 = vmatmul.msk.f32.vlgmr.msrb.gmra.mxu0 %vm321_vm0, %v1184_v13  ;;  %533 = vmatpush.msrb.mxu3 %v863_v23 }
  0x2b   : > { %561 = vmatpush.msra.mxu0 %v871_v24 }
  0x2c   : > { %534 = vmatpush.msrb.mxu3 %v862_v25 }
  0x2d   : > { %867 = vmatmul.msk.f32.vlgmr.msrb.gmra.mxu3 %vm321_vm0, %v1184_v13  ;;  %562 = vmatpush.msra.mxu0 %v870_v26 }
  0x2e   : > { %645 = vmatpush.msra.mxu3 %v884_v29 }
  0x2f   : > { %563 = vmatpush.msra.mxu0 %v869_v27 }
  0x30   : > { %646 = vmatpush.msra.mxu3 %v883_v30 }
  0x31   : > { %564 = vmatpush.msra.mxu0 %v868_v28 }
  0x32   : > { %873 = vmatmul.msk.f32.vlgmr.msra.gmra.mxu0 %vm321_vm0, %v1184_v13  ;;  %647 = vmatpush.msra.mxu3 %v882_v31 }
  0x34   : > { %648 = vmatpush.msra.mxu3 %v881_v32 }
  0x35   : > { %886 = vmatmul.msk.f32.vlgmr.msra.gmra.mxu3 %vm321_vm0, %v1184_v13 }
  0x9f   : > { %v342_v34 = vpop.f32.mrf.mxu0 }
  0xa0   : > { %v343_v35 = vadd.f32 %v938_v33, %v342_v34 }
  0xa1   : > { %v371_v38 = vpop.f32.mrf.mxu1 }
  0xa2   : > { %v372_v40 = vadd.f32 %v940_v36, %v371_v38  ;;  %345 = vst.msk [vmem:[%s1277_s19] sm:$0xff] %vm321_vm0, %v343_v35 }
  0xa4   : > { %v399_v39 = vpop.f32.mrf.mxu2 }
  0xa5   : > { %v400_v42 = vadd.f32 %v939_v37, %v399_v39 }
  0xa7   : > { %504 = vmatpush.msrb.mxu2 %v400_v42  ;;  %v459_v45 = vpop.f32.mrf.mxu0 }
  0xa8   : > { %861 = vmatmul.msk.f32.vlgmr.msrb.gmra.mxu2 %vm462_vm1, %v372_v40  ;;  %v460_v46 = vadd.f32 %v941_v41, %v459_v45  ;;  %v429_v48 = vpop.f32.mrf.mxu3 }
  0xa9   : > { %615 = vmatpush.msra.mxu2 %v878_v44  ;;  %v430_v49 = vadd.f32 %v942_v43, %v429_v48 }
  0xaa   : > { %481 = vmatpush.msrb.mxu1 %v460_v46 }
  0xab   : > { %616 = vmatpush.msra.mxu2 %v877_v47  ;;  %860 = vmatmul.msk.f32.vlgmr.msrb.gmra.mxu1 %vm462_vm1, %v430_v49 }
  0xad   : > { %617 = vmatpush.msra.mxu2 %v876_v50 }
  0xaf   : > { %618 = vmatpush.msra.mxu2 %v875_v51  ;;  %v566_v54 = vpop.f32.mrf.mxu0 }
  0xb0   : > { %880 = vmatmul.msk.f32.vlgmr.msra.gmra.mxu2 %vm321_vm0, %v1184_v13  ;;  %v567_v55 = vadd.f32 %v943_v52, %v566_v54  ;;  %v536_v56 = vpop.f32.mrf.mxu3 }
  0xb1   : > { %v537_v57 = vadd.f32 %v944_v53, %v536_v56 }
  0xb2   : > { %587 = vmatpush.msra.mxu1 %v567_v55 }
  0xb3   : > { %874 = vmatmul.msk.f32.vlgmr.msra.gmra.mxu1 %vm462_vm1, %v537_v57 }
  0xb8   : > { %v650_v59 = vpop.f32.mrf.mxu3 }
  0xb9   : > { %v651_v60 = vadd.f32 %v945_v58, %v650_v59 }
  0xbb   : > { %671 = vmatpush.msrb.mxu0 %v651_v60 }
 0x12b   : > { %v506_v61 = vpop.f32.mrf.mxu2 }
 0x133   : > { %v620_v63 = vpop.f32.mrf.mxu2 }
 0x134   : > { %v621_v0 = vadd.f32 %v946_v62, %v620_v63 }
 0x136   : > { %887 = vmatmul.msk.f32.vlgmr.msrb.gmra.mxu0 %vm462_vm1, %v621_v0 }
 0x137   : > { %978 = shalt.err (!%p975_p3)
}
 0x138   : > { %895 = dma.vmem_to_hbm [thread:$0]  (%p1130_p5), %s744_s22, 128, %s746_s13, %s717_s23   ;;  %v483_v1 = vpop.f32.mrf.mxu1 }
 0x139   : > { %v507_v3 = vadd.f32 %v506_v61, %v483_v1  ;;  %s727_s2 = scalar_lea.hbm %s1377_s7, %s890_s17  ;;  %s1388_s12 = sshll.u32 %s1269_s10, 3 }
 0x13a   : > { %s300_s19 = scalar_lea.vmem [#allocation2], %s1388_s12  ;;  %s731_s20 = sshll.u32 %s727_s2, 4  ;;  %s732_s20 = int_to_ptr.hbm [resolvable:$true] %s731_s20 }
 0x13b   : > { %s729_s18 = sshll.u32 %s300_s19, 4  ;;  %s712_s9 = scalar_lea.sflag [#allocation3], %s1269_s10  ;;  %s730_s18 = int_to_ptr.vmem [resolvable:$true] %s729_s18 }
 0x13c   : > { %s993_s21 = sshra.s32 %s732_s20, 4  ;;  %s999_s23 = scalar_lea.hbm %s1377_s7, 16  ;;  %s994_s21 = int_to_ptr.hbm [resolvable:$true] %s993_s21 }
 0x13d   : > { %s995_s17 = scalar_lea.hbm %s994_s21, 8  ;;  %p1000_p9 = scmp.lt.s32.totalorder %s994_s21, %s1377_s7 }
 0x13e   : > { %p996_p4 = scmp.ne.s32.totalorder %s994_s21, %s995_s17  ;;  %p1001_p10 = scmp.lt.s32.totalorder %s999_s23, %s995_s17 }
 0x140   : > { %v589_v2 = vpop.f32.mrf.mxu1  ;;  %p997_p7 = pnand %p996_p4, %p1130_p5  ;;  %p1002_p11 = por %p1001_p10, %p1000_p9 }
 0x141   : > { %v592_v4 = vadd.f32 %v589_v2, %v507_v3 }
 0x142   : > { %p998_p8 = pneg %p997_p7 }
 0x144   : > { %p1003_p12 = pnand %p1002_p11, %p998_p8 }
 0x1b3   : > { %v673_v5 = vpop.f32.mrf.mxu0 }
 0x1b4   : > { %v676_v6 = vadd.f32 %v673_v5, %v592_v4 }
 0x1b6   : > { %v677_v7 = vmul.f32 0.17677669, %v676_v6 }
 0x1b8   : > { %v678_v8 = vsel %vm462_vm1, %v677_v7, -inf }
 0x1b9   : > { %v679_v9 = vrot.slane %v678_v8, 4 }
 0x1bb   : > { %v680_v10 = vmax.f32 %v678_v8, %v679_v9 }
 0x1bd   : > { %v681_v11 = vrot.slane %v680_v10, 2 }
 0x1bf   : > { %v682_v12 = vmax.f32 %v680_v10, %v681_v11 }
 0x1c1   : > { %v683_v13 = vrot.slane %v682_v12, 1 }
 0x1c3   : > { %v684_v14 = vmax.f32 %v682_v12, %v683_v13 }
 0x1c5   : > { %v685_v15 = vsub.f32 %v677_v7, %v684_v14 }
 0x1c7   : > { %v686_v16 = vmul.f32 1.442695, %v685_v15 }
 0x1c9   : > { %947 = vpow2.f32 %v686_v16 }
 0x1cf   : > { %v948_v17 = vpop.eup %947 }
 0x1d0   : > { %v688_v18 = vsel %vm462_vm1, %v948_v17, 0.0 }
 0x1d1   : > { %v689_v19 = vrot.slane %v688_v18, 4 }
 0x1d3   : > { %v690_v20 = vadd.f32 %v689_v19, %v688_v18 }
 0x1d5   : > { %v691_v21 = vrot.slane %v690_v20, 2 }
 0x1d7   : > { %v692_v22 = vadd.f32 %v691_v21, %v690_v20 }
 0x1d9   : > { %v693_v23 = vrot.slane %v692_v22, 1 }
 0x1db   : > { %v694_v24 = vadd.f32 %v693_v23, %v692_v22 }
 0x1dd   : > { %949 = vrcp.f32 %v694_v24  ;;  %v706_v28 = vand.u32 2147483648, %v694_v24  ;;  %v704_v30 = vand.u32 2147483647, %v694_v24  ;;  %vm700_vm3 = vweird.f32 %v694_v24 }
 0x1df   : > { %v707_v32 = vor.u32 1.1754944e-38, %v706_v28  ;;  %vm705_vm5 = vcmp.eq.f32.partialorder %v704_v30, 8.507059e+37 }
 0x1e3   : > { %v950_v25 = vpop.eup %949 }
 0x1e4   : > { %v696_v26 = vmul.f32 %v950_v25, %v694_v24  ;;  %vm701_vm2 = vweird.f32 %v950_v25 }
 0x1e5   : > { %vm702_vm4 = vmor %vm700_vm3, %vm701_vm2 }
 0x1e6   : > { %v697_v27 = vsub.f32 1.0, %v696_v26 }
 0x1e8   : > { %v698_v29 = vmul.f32 %v950_v25, %v697_v27 }
 0x1ea   : > { %v699_v31 = vadd.f32 %v950_v25, %v698_v29 }
 0x1ec   : > { %v703_v33 = vsel %vm702_vm4, %v950_v25, %v699_v31 }
 0x1ed   : > { %v708_v34 = vsel %vm705_vm5, %v707_v32, %v703_v33 }
 0x1ee   : > { %v709_v35 = vmul.f32 %v948_v17, %v708_v34 }
 0x1f0   : > { %710 = vst.msk [vmem:[%s300_s19] sm:$0xff] %vm462_vm1, %v709_v35 }
 0x1f1   : > { %1006 = shalt.err (!%p1003_p12)
}
 0x1f2   : > { %894 = dma.vmem_to_hbm [thread:$0]  (%p1130_p5), %s730_s18, 128, %s732_s20, %s712_s9  }
 0x1f3 PF: > { %p905_p13 = scmp.ge.s32.totalorder %s1045_s30, 2  ;;  %s757_s10 = sand.u32 1, %s1033_s27  }
 0x1f4   : > { %s758_s26 = scalar_lea.sflag [#allocation3], %s757_s10 }
 0x1f5   : > { %p899_p0 = pnand %p905_p13, %p1134_p6 }
 0x1f7   : > { %p900_p1 = pneg %p899_p0 }
 0x1f9   : > { %1024 = dma.done.wait (%p900_p1), %s758_s26, 128  }
 0x1fa   : > { %1026 = vsyncadd (%p900_p1), %s758_s26, 4294967168  ;;  %s768_s0 = scalar_lea.sflag [#allocation5], %s757_s10 }
 0x1fb   : > { %1028 = dma.done.wait (%p900_p1), %s768_s0, 128  }
 0x1fc   : > { %1030 = vsyncadd (%p900_p1), %s768_s0, 4294967168  ;;  %p22_p5 = scmp.ge.s32.totalorder %s1117_s11, 4   ;;  %s1389_s27 = smov %s1037_s28 }
 0x1fd   : > { %s1390_s28 = smov %s1041_s29  ;;  %s1391_s29 = smov %s1128_s14 }
 0x1fe   : > { %s1392_s30 = smov %s1117_s11  ;;  %24 = sbr.rel (!%p22_p5) target bundleno = 9 (0x9), region = 112 }
 0x203   :  { %774 = vsyncpa [#allocation3], 1 }
 0x204   :  { %776 = vsyncpa [#allocation3 + $0x1], 1 }
 0x205   :  { %777 = vsyncpa [#allocation5], 1 }
 0x206   :  { %779 = vsyncpa [#allocation5 + $0x1], 1 }

</bundles_post_ra>
